<compile_context>
chip_gen: v6e
topology: v6e:2x2x1
jax: 0.10.0
libtpu: 0.0.40
codegen_flags: <defaults>
</compile_context>

<pallas_src>
import jax
import jax.numpy as jnp
from jax import lax
from jax.experimental import pallas as pl
from jax.experimental.pallas import tpu as pltpu

# ---- module hyper-parameters (stand-ins for `rules` / `dims`) --------------
VISION_SIZE = (20, 20)             # rules['VisionSize']
KS = VISION_SIZE[0] // 10          # conv kernel size -> 2
DIMS = (32, 16)                    # dims argument of AgentBrain
CONV_OUT_H = VISION_SIZE[0] + 1 - KS
CONV_OUT_W = VISION_SIZE[1] + 1 - KS
FLAT = CONV_OUT_H * CONV_OUT_W     # prelin input features (19*19 = 361)
N_OUT = 5
N_PAD = 128                        # lane-dense output width (pad 5 -> 128)
K_IN = 3 * VISION_SIZE[0] * VISION_SIZE[1]   # 1200 flattened input features
MIN_PALLAS_BATCH = 64              # below this a fused XLA dot is faster


def _round_up(x, m):
    return (x + m - 1) // m * m


def _choose_tm(B):
    """Batch tile: largest of {1024,512,256,128} keeping >= 2 grid steps."""
    if B <= 128:
        # Single (possibly ragged) block; multiple of 16 so bf16 sublane
        # packing is natively aligned.
        return min(128, _round_up(B, 16))
    for tm in (1024, 512, 256, 128):
        if B >= 2 * tm:                  # keep grid >= 2 for v7x's 2 TCs
            return tm
    return 128                           # 128 < B < 256 -> two blocks


# ---- Pallas kernel: one matmul + bias + softsign ---------------------------
def _brain_kernel(x_ref, g_ref, b_ref, o_ref):
    # x_ref: [TM, K_IN] (any float dtype)   g_ref: [K_IN, N_PAD] bf16
    # b_ref: [1, N_PAD] f32                 o_ref: [TM, N_PAD] f32
    x = x_ref[...].astype(jnp.bfloat16)        # VPU cast, hidden under matmul
    y = jnp.dot(x, g_ref[...], preferred_element_type=jnp.float32) + b_ref[...]
    # Softsign: y / (1 + |y|); divide goes to the EUP slot via approx recip.
    o_ref[...] = y * pl.reciprocal(1.0 + jnp.abs(y), approx=True)


# ---- one-time parameter folding (pure prep, no per-call cost) --------------
def fold_params(params):
    """Fold conv + all Linears into (G [K_IN,N_PAD] bf16, b [1,N_PAD] f32)."""
    conv_w, conv_b, lin_ws, lin_bs = params

    # 1) Collapse the activation-free Linear chain: y = flat @ W_comb + b_comb
    W_comb = lin_ws[0].T.astype(jnp.float32)                 # [FLAT, d0]
    b_comb = lin_bs[0].astype(jnp.float32)
    for w, b in zip(lin_ws[1:], lin_bs[1:]):
        W_comb = W_comb @ w.T
        b_comb = b_comb @ w.T + b                            # -> [N_OUT]

    # 2) Fold the conv bias: flat = conv_nobias(x) + cb
    b_final = b_comb + conv_b[0] * W_comb.sum(axis=0)        # [N_OUT]

    # 3) Fold the conv weight: y = flatten(x) @ G + b_final with
    #    G[c, p, q, :] = sum_{di,dj} cw[0,c,di,dj] * W_comb[(p-di)*W'+(q-dj), :]
    Wc = W_comb.reshape(CONV_OUT_H, CONV_OUT_W, N_OUT)
    G = jnp.zeros((3, VISION_SIZE[0], VISION_SIZE[1], N_OUT), jnp.float32)
    for di in range(KS):
        for dj in range(KS):
            G = G.at[:, di:di + CONV_OUT_H, dj:dj + CONV_OUT_W, :].add(
                conv_w[0, :, di, dj][:, None, None, None] * Wc[None, :, :, :])
    G = G.reshape(K_IN, N_OUT)

    # 4) Pad the output (lane) dim to 128; padded lanes have zero weight/bias
    #    so those outputs stay inert (sliced off in the wrapper).  G is stored
    #    bf16 (halves the per-call weight DMA, native MXU rate); the bias is
    #    added post-accumulate in f32 and is only 512 B, so it stays f32.
    #    K_IN=1200 is deliberately NOT padded to a 128 multiple: padding G's K
    #    while the activation tile's pad lanes are uninitialized could
    #    propagate NaN*0, and a per-call activation pad would cost more than
    #    the one partially-masked K tile it saves.
    G_pad = (jnp.zeros((K_IN, N_PAD), jnp.float32).at[:, :N_OUT].set(G)
             .astype(jnp.bfloat16))
    b_pad = jnp.zeros((1, N_PAD), jnp.float32).at[0, :N_OUT].set(b_final)
    return G_pad, b_pad


# ---- wrapper ----------------------------------------------------------------
def agent_brain_forward(x, folded):
    """x: [B, 3, 20, 20] (bf16 or f32) -> [B, 5] f32. `folded` = fold_params."""
    G, b = folded
    B = x.shape[0]
    # Contiguous reshape only -- NO dtype cast here: a standalone wrapper cast
    # is an extra HBM read+write of the whole batch.  Producers should hand
    # over bf16 activations; the kernel casts whatever arrives.
    xf = x.reshape(B, K_IN)

    if B < MIN_PALLAS_BATCH:
        # Tiny batches: pallas_call fixed overhead + weight DMA dominate; a
        # fused XLA dot is at parity or faster.
        y = jnp.dot(xf.astype(jnp.bfloat16), G,
                    preferred_element_type=jnp.float32) + b
        return (y / (1.0 + jnp.abs(y)))[:, :N_OUT]

    TM = _choose_tm(B)
    grid = (pl.cdiv(B, TM),)   # ragged last block instead of a jnp.pad copy

    out = pl.pallas_call(
        _brain_kernel,
        out_shape=jax.ShapeDtypeStruct((B, N_PAD), jnp.float32),
        grid_spec=pltpu.PrefetchScalarGridSpec(
            num_scalar_prefetch=0,
            grid=grid,
            in_specs=[
                pl.BlockSpec((TM, K_IN), lambda i: (i, 0)),      # activations
                pl.BlockSpec((K_IN, N_PAD), lambda i: (0, 0)),   # folded weight
                pl.BlockSpec((1, N_PAD), lambda i: (0, 0)),      # folded bias
            ],
            out_specs=pl.BlockSpec((TM, N_PAD), lambda i: (i, 0)),
        ),
        compiler_params=pltpu.CompilerParams(
            dimension_semantics=("parallel",)),
    )(xf, G, b)
    return out[:, :N_OUT]


# ---- deterministic parameter init (PyTorch-style uniform bounds) ------------
def init_params(key):
    keys = iter(jax.random.split(key, 16))

    def lin_init(fan_in, fan_out):
        bound = 1.0 / (fan_in ** 0.5)
        w = jax.random.uniform(next(keys), (fan_out, fan_in), jnp.float32,
                               -bound, bound)
        b = jax.random.uniform(next(keys), (fan_out,), jnp.float32,
                               -bound, bound)
        return w, b

    conv_fan_in = 3 * KS * KS
    cbound = 1.0 / (conv_fan_in ** 0.5)
    conv_w = jax.random.uniform(next(keys), (1, 3, KS, KS), jnp.float32,
                                -cbound, cbound)
    conv_b = jax.random.uniform(next(keys), (1,), jnp.float32, -cbound, cbound)

    lin_ws, lin_bs = [], []
    chain = [(FLAT, DIMS[0])]
    chain += [(DIMS[i], DIMS[i + 1]) for i in range(len(DIMS) - 1)]
    chain += [(DIMS[-1], N_OUT)]
    for fi, fo in chain:
        w, b = lin_init(fi, fo)
        lin_ws.append(w)
        lin_bs.append(b)
    return conv_w, conv_b, lin_ws, lin_bs


# ---- plain-JAX reference (unfused, mirrors the PyTorch forward) -------------
def reference_forward(x, params):
    conv_w, conv_b, lin_ws, lin_bs = params
    h = lax.conv_general_dilated(
        x.astype(jnp.float32), conv_w, window_strides=(1, 1), padding="VALID",
        dimension_numbers=("NCHW", "OIHW", "NCHW"))
    h = h + conv_b.reshape(1, 1, 1, 1)
    h = h.reshape(x.shape[0], -1)                 # per-agent flatten
    for w, b in zip(lin_ws, lin_bs):
        h = h @ w.T + b
    return h / (1.0 + jnp.abs(h))


if __name__ == "__main__":
    key = jax.random.PRNGKey(0)
    kx, kp = jax.random.split(key)
    B = 256                                        # batch of agents (M rows)
    # Producer hands over bf16 activations (end-to-end bf16 path).
    x = jax.random.normal(
        kx, (B, 3, VISION_SIZE[0], VISION_SIZE[1]), jnp.bfloat16)
    params = init_params(kp)
    folded = fold_params(params)                   # one-time parameter prep

    fwd = jax.jit(agent_brain_forward)
    y = fwd(x, folded)                             # Pallas path (B >= 64)
    jax.block_until_ready(y)

    y_ref = reference_forward(x, params)
    assert y.shape == (B, N_OUT), y.shape
    # Tolerance covers the bf16 folded weight / bf16 activations, the f32
    # re-association from the algebraic fold, and the EUP approx reciprocal.
    max_err = float(jnp.max(jnp.abs(y - y_ref)))
    assert max_err < 2e-2, (max_err, y[:2], y_ref[:2])
    print("KERNEL_OK")
</pallas_src>

<mosaic_0001>
module attributes {stable_mosaic.version = 11 : i64} {
  func.func @_brain_kernel(%arg0: i32, %arg1: memref<128x1200xbf16, #tpu.memory_space<vmem>>, %arg2: memref<1200x128xbf16, #tpu.memory_space<vmem>>, %arg3: memref<1x128xf32, #tpu.memory_space<vmem>>, %arg4: memref<128x128xf32, #tpu.memory_space<vmem>>) attributes {dimension_semantics = [#tpu.dimension_semantics<parallel>], iteration_bounds = array<i64: 2>, scalar_prefetch = 0 : i64, scratch_operands = 0 : i64, tpu.core_type = #tpu.core_type<tc>, window_params = [{transform_indices = @transform_0, window_bounds = array<i64: 128, 1200>}, {pipeline_mode = #tpu.pipeline_mode<synchronous>, transform_indices = @transform_1, window_bounds = array<i64: 1200, 128>}, {pipeline_mode = #tpu.pipeline_mode<synchronous>, transform_indices = @transform_2, window_bounds = array<i64: 1, 128>}, {transform_indices = @transform_3, window_bounds = array<i64: 128, 128>}]} {
    %c0 = arith.constant 0 : index
    %c0_0 = arith.constant 0 : index
    %0 = vector.load %arg1[%c0, %c0_0] : memref<128x1200xbf16, #tpu.memory_space<vmem>>, vector<128x1200xbf16>
    %c0_1 = arith.constant 0 : index
    %c0_2 = arith.constant 0 : index
    %1 = vector.load %arg2[%c0_1, %c0_2] : memref<1200x128xbf16, #tpu.memory_space<vmem>>, vector<1200x128xbf16>
    %cst = arith.constant dense<0.000000e+00> : vector<128x128xf32>
    %2 = tpu.matmul %0, %1, %cst {dimension_numbers = #tpu.dot_dimension_numbers<[1], [0], [0], [1], [0, 0, 1, 1], [], []>} : vector<128x1200xbf16>, vector<1200x128xbf16>, vector<128x128xf32> -> vector<128x128xf32>
    %c0_3 = arith.constant 0 : index
    %c0_4 = arith.constant 0 : index
    %3 = vector.load %arg3[%c0_3, %c0_4] : memref<1x128xf32, #tpu.memory_space<vmem>>, vector<1x128xf32>
    %4 = vector.broadcast %3 : vector<1x128xf32> to vector<128x128xf32>
    %5 = arith.addf %2, %4 : vector<128x128xf32>
    %6 = math.absf %5 : vector<128x128xf32>
    %cst_5 = arith.constant 1.000000e+00 : f32
    %7 = vector.broadcast %cst_5 : f32 to vector<128x128xf32>
    %8 = arith.addf %7, %6 : vector<128x128xf32>
    %9 = tpu.reciprocal %8 {approx = true} : vector<128x128xf32> -> vector<128x128xf32>
    %10 = arith.mulf %5, %9 : vector<128x128xf32>
    %c0_6 = arith.constant 0 : index
    %c0_7 = arith.constant 0 : index
    %11 = vector.load %arg4[%c0_6, %c0_7] : memref<128x128xf32, #tpu.memory_space<vmem>>, vector<128x128xf32>
    tpu.vector_store %arg4[%c0_6, %c0_7], %10 {strides = array<i32>} : memref<128x128xf32, #tpu.memory_space<vmem>>, vector<128x128xf32>,
    return
  }
  func.func @transform_0(%arg0: i32) -> (i32, i32) {
    %c0_i32 = arith.constant 0 : i32
    %c0_i32_0 = arith.constant 0 : i32
    return %arg0, %c0_i32 : i32, i32
  }
  func.func @transform_1(%arg0: i32) -> (i32, i32) {
    %c0_i32 = arith.constant 0 : i32
    %c0_i32_0 = arith.constant 0 : i32
    %c0_i32_1 = arith.constant 0 : i32
    return %c0_i32, %c0_i32_0 : i32, i32
  }
  func.func @transform_2(%arg0: i32) -> (i32, i32) {
    %c0_i32 = arith.constant 0 : i32
    %c0_i32_0 = arith.constant 0 : i32
    %c0_i32_1 = arith.constant 0 : i32
    return %c0_i32, %c0_i32_0 : i32, i32
  }
  func.func @transform_3(%arg0: i32) -> (i32, i32) {
    %c0_i32 = arith.constant 0 : i32
    %c0_i32_0 = arith.constant 0 : i32
    return %arg0, %c0_i32 : i32, i32
  }
}

</mosaic_0001>

<bundles_post_ra>
// kernel: agent_brain_forward.1
= control target key start
LH: loop header
LB: loop body
LE: loop exit
PB: predicated region body
PF: predicated region fallthrough
CT: control target
= control target key end

     0   :  { %s2616_s12 = smov 0   ;;  %s3104_s0 = inlined_call_operand.vmem [shape: bf16[256,1200], index: 0, kind: input, shape index: {}]   ;;  %s3105_s1 = inlined_call_operand.vmem [shape: bf16[1200,128], index: 1, kind: input, shape index: {}]   ;;  %s3106_s2 = inlined_call_operand.vmem [shape: f32[1,128], index: 2, kind: input, shape index: {}]   ;;  %s3107_s3 = inlined_call_operand.vmem [shape: f32[256,128], index: 3, kind: output, shape index: {}]  }
   0x1 LB: > { %s1903_s13 = sadd.s32 4294967295, %s2593_s12   ;;  %p1907_p0 = scmp.ge.s32.totalorder %s2593_s12, 1  ;;  %s2593_s12 = sphi %s2616_s12, %s13_s12  }
   0x2   : > { %p139_p1 = scmp.lt.s32.totalorder %s2593_s12, 3 }
   0x4   : > { %p140_p2 = pnand %p1907_p0, %p139_p1 }
   0x5   : > { %s1908_s16 = sshll.u32 (!%p140_p2), %s1903_s13, 4 }
   0x6   : > { %143 = sbr.rel (%p140_p2) target bundleno = 422 (0x1a6), region = 32  ;;  %p165_p3 = scmp.lt.s32.totalorder (!%p140_p2), %s1908_s16, 31 }
   0xb   : > { %v2360_v0 = vld [vmem:[%s3105_s1 + $0x78] sm:$0xff]   ;;  %v2362_v2 = vld [vmem:[%s3105_s1 + $0x70] sm:$0xff]   ;;  %v2364_v4 = vld [vmem:[%s3105_s1 + $0x68] sm:$0xff]   ;;  %s3109_s16 = smov (!%p165_p3, %s1908_s16), 31  ;;  %vm1257_vm0 = vcmask 392192  }
   0xc   : > { %v2361_v1 = vld [vmem:[%s3105_s1 + $0x38] sm:$0xff]   ;;  %2334 = vmatprep.subr.bf16.mxu1 %v2360_v0  ;;  %2078 = vmatprep.subr.bf16.mxu0 %v2360_v0  ;;  %v2363_v3 = vld [vmem:[%s3105_s1 + $0x30] sm:$0xff]   ;;  %v2365_v5 = vld [vmem:[%s3105_s1 + $0x28] sm:$0xff]   ;;  %s2350_s29 = smul.u32 40, %s3109_s16  ;;  %s1911_s25 = sshll.u32 %s3109_s16, 3 }
   0xd   : > { %2342 = vmatpush3.bf16.msra.mxu1 %v2361_v1  ;;  %2079 = vmatpush3.bf16.msra.mxu0 %v2361_v1  ;;  %v2366_v6 = vld [vmem:[%s3105_s1 + $0x60] sm:$0xff]   ;;  %v2368_v8 = vld [vmem:[%s3105_s1 + $0x58] sm:$0xff]   ;;  %v2370_v10 = vld [vmem:[%s3105_s1 + $0x50] sm:$0xff]   ;;  %s3052_s28 = scalar_lea.vmem %s3107_s3, %s1911_s25 }
   0xe   : > { %2335 = vmatprep.subr.bf16.mxu1 %v2362_v2  ;;  %2080 = vmatprep.subr.bf16.mxu0 %v2362_v2  ;;  %v2367_v7 = vld [vmem:[%s3105_s1 + $0x20] sm:$0xff]   ;;  %s2657_s9 = scalar_lea.vmem %s3104_s0, %s2350_s29  ;;  %v2369_v9 = vld [vmem:[%s3105_s1 + $0x18] sm:$0xff]   ;;  %v2371_v13 = vld [vmem:[%s3105_s1 + $0x10] sm:$0xff]  }
   0xf   : > { %v2378_v11 = vld [vmem:[%s2657_s9 + $0x144] ss:$40 sps:$4 sm:$0xff]   ;;  %v2376_v18 = vld [vmem:[%s2657_s9 + $0x140] ss:$40 sps:$4 sm:$0xff]   ;;  %v2382_v20 = vld [vmem:[%s3105_s1 + $0xf8] sm:$0xff]  }
  0x10   : > { %v2381_v12 = vld [vmem:[%s2657_s9 + $0x4] ss:$40 sps:$4 sm:$0xff]   ;;  %1346 = vmatprep.mubr.bf16.mxu1 %v2378_v11  ;;  %v2379_v19 = vld [vmem:[%s2657_s9] ss:$40 sps:$4 sm:$0xff]   ;;  %v2384_v21 = vld [vmem:[%s3105_s1 + $0x178] sm:$0xff]  }
  0x11   : > { %2343 = vmatpush3.bf16.msra.mxu1 %v2363_v3  ;;  %2081 = vmatpush3.bf16.msra.mxu0 %v2363_v3  ;;  %v2372_v14 = vld [vmem:[%s3105_s1 + $0x48] sm:$0xff]   ;;  %v2374_v16 = vld [vmem:[%s3105_s1 + $0x40] sm:$0xff]   ;;  %v2383_v22 = vld [vmem:[%s3105_s1 + $0xb8] sm:$0xff]  }
  0x12   : > { %2336 = vmatprep.subr.bf16.mxu1 %v2364_v4  ;;  %2082 = vmatprep.subr.bf16.mxu0 %v2364_v4  ;;  %v2373_v15 = vld [vmem:[%s3105_s1 + $0x8] sm:$0xff]   ;;  %v2375_v17 = vld [vmem:[%s3105_s1] sm:$0xff]   ;;  %v2385_v23 = vld [vmem:[%s3105_s1 + $0x138] sm:$0xff]  }
  0x13   : > { %1314 = vmatprep.mubr.bf16.mxu0 %v2381_v12  ;;  %v2386_v24 = vld [vmem:[%s3105_s1 + $0xf0] sm:$0xff]   ;;  %v2395_v30 = vld [vmem:[%s3105_s1 + $0xe8] sm:$0xff]   ;;  %v2400_v36 = vld [vmem:[%s3105_s1 + $0xe0] sm:$0xff]  }
  0x14   : > { %v2388_v25 = vld [vmem:[%s3105_s1 + $0x170] sm:$0xff]   ;;  %v2398_v32 = vld [vmem:[%s3105_s1 + $0x168] sm:$0xff]   ;;  %v2402_v37 = vld [vmem:[%s3105_s1 + $0x160] sm:$0xff]  }
  0x15   : > { %2344 = vmatpush3.bf16.msra.mxu1 %v2365_v5  ;;  %2083 = vmatpush3.bf16.msra.mxu0 %v2365_v5  ;;  %v2390_v26 = vld [vmem:[%s2657_s9 + $0x194] ss:$40 sps:$4 sm:$0xff]   ;;  %v2394_v31 = vld [vmem:[%s2657_s9 + $0x190] ss:$40 sps:$4 sm:$0xff]   ;;  %v2397_v34 = vld [vmem:[%s3105_s1 + $0xa8] sm:$0xff]  }
  0x16   : > { %2337 = vmatprep.subr.bf16.mxu1 %v2366_v6  ;;  %2084 = vmatprep.subr.bf16.mxu0 %v2366_v6  ;;  %v2387_v27 = vld [vmem:[%s3105_s1 + $0xb0] sm:$0xff]   ;;  %v2399_v35 = vld [vmem:[%s3105_s1 + $0x128] sm:$0xff]   ;;  %v2401_v39 = vld [vmem:[%s3105_s1 + $0xa0] sm:$0xff]  }
  0x17   : > { %v2392_v28 = vld [vmem:[%s2657_s9 + $0x54] ss:$40 sps:$4 sm:$0xff]   ;;  %v2396_v33 = vld [vmem:[%s2657_s9 + $0x50] ss:$40 sps:$4 sm:$0xff]   ;;  %v2404_v38 = vld [vmem:[%s2657_s9 + $0x1e4] ss:$40 sps:$4 sm:$0xff]  }
  0x18   : > { %v2389_v29 = vld [vmem:[%s3105_s1 + $0x130] sm:$0xff]   ;;  %v2406_v40 = vld [vmem:[%s2657_s9 + $0xa4] ss:$40 sps:$4 sm:$0xff]   ;;  %v2409_v42 = vld [vmem:[%s3105_s1 + $0xd8] sm:$0xff]  }
  0x19   : > { %2345 = vmatpush3.bf16.msra.mxu1 %v2367_v7  ;;  %2085 = vmatpush3.bf16.msra.mxu0 %v2367_v7  ;;  %v2403_v41 = vld [vmem:[%s3105_s1 + $0x120] sm:$0xff]   ;;  %v2412_v45 = vld [vmem:[%s3105_s1 + $0x158] sm:$0xff]   ;;  %v2414_v48 = vld [vmem:[%s3105_s1 + $0xd0] sm:$0xff]   ;;  %v2595_v7 = vmov 0  }
  0x1a   : > { %2338 = vmatprep.subr.bf16.mxu1 %v2368_v8  ;;  %2086 = vmatprep.subr.bf16.mxu0 %v2368_v8  ;;  %v2408_v43 = vld [vmem:[%s2657_s9 + $0x1e0] ss:$40 sps:$4 sm:$0xff]   ;;  %v2411_v46 = vld [vmem:[%s3105_s1 + $0x98] sm:$0xff]   ;;  %v2416_v49 = vld [vmem:[%s3105_s1 + $0x150] sm:$0xff]  }
  0x1b   : > { %v2410_v44 = vld [vmem:[%s2657_s9 + $0xa0] ss:$40 sps:$4 sm:$0xff]   ;;  %v2413_v47 = vld [vmem:[%s3105_s1 + $0x118] sm:$0xff]   ;;  %v2415_v52 = vld [vmem:[%s3105_s1 + $0x90] sm:$0xff]  }
  0x1c   : > { %v2418_v50 = vld [vmem:[%s2657_s9 + $0x234] ss:$40 sps:$4 sm:$0xff]   ;;  %v2423_v54 = vld [vmem:[%s3105_s1 + $0xc8] sm:$0xff]   ;;  %v2422_v55 = vld [vmem:[%s2657_s9 + $0x230] ss:$40 sps:$4 sm:$0xff]  }
  0x1d   : > { %2346 = vmatpush3.bf16.msra.mxu1 %v2369_v9  ;;  %2087 = vmatpush3.bf16.msra.mxu0 %v2369_v9  ;;  %v2420_v51 = vld [vmem:[%s2657_s9 + $0xf4] ss:$40 sps:$4 sm:$0xff]   ;;  %v2424_v56 = vld [vmem:[%s2657_s9 + $0xf0] ss:$40 sps:$4 sm:$0xff]   ;;  %v2426_v57 = vld [vmem:[%s3105_s1 + $0x148] sm:$0xff]  }
  0x1e   : > { %2339 = vmatprep.subr.bf16.mxu1 %v2370_v10  ;;  %2088 = vmatprep.subr.bf16.mxu0 %v2370_v10  ;;  %v2417_v53 = vld [vmem:[%s3105_s1 + $0x110] sm:$0xff]   ;;  %v2425_v58 = vld [vmem:[%s3105_s1 + $0x88] sm:$0xff]   ;;  %v2428_v60 = vld [vmem:[%s3105_s1 + $0xc0] sm:$0xff]  }
  0x1f   : > { %v2427_v59 = vld [vmem:[%s3105_s1 + $0x108] sm:$0xff]   ;;  %v2430_v61 = vld [vmem:[%s3105_s1 + $0x140] sm:$0xff]   ;;  %v2435_v2 = vld [vmem:[%s2657_s9 + $0x10] ss:$40 sps:$4 sm:$0xff]  }
  0x20   : > { %v2429_v62 = vld [vmem:[%s3105_s1 + $0x80] sm:$0xff]   ;;  %v2434_v0 = vld [vmem:[%s2657_s9 + $0xc] ss:$40 sps:$4 sm:$0xff]   ;;  %v2432_v1 = vld [vmem:[%s2657_s9 + $0x8] ss:$40 sps:$4 sm:$0xff]  }
  0x21   : > { %2347 = vmatpush3.bf16.msra.mxu1 %v2371_v13  ;;  %2089 = vmatpush3.bf16.msra.mxu0 %v2371_v13  ;;  %v2431_v63 = vld [vmem:[%s3105_s1 + $0x100] sm:$0xff]   ;;  %v2437_v3 = vld [vmem:[%s2657_s9 + $0x14] ss:$40 sps:$4 sm:$0xff]  }
  0x22   : > { %2340 = vmatprep.subr.bf16.mxu1 %v2372_v14  ;;  %2090 = vmatprep.subr.bf16.mxu0 %v2372_v14  ;;  %v2438_v4 = vld [vmem:[%s3105_s1 + $0x1f8] sm:$0xff]   ;;  %v2444_v9 = vld [vmem:[%s2657_s9 + $0x64] ss:$40 sps:$4 sm:$0xff]   ;;  %v2446_v10 = vld [vmem:[%s3105_s1 + $0x1f0] sm:$0xff]  }
  0x23   : > { %v2439_v5 = vld [vmem:[%s3105_s1 + $0x1b8] sm:$0xff]   ;;  %v2448_v12 = vld [vmem:[%s3105_s1 + $0x1b0] sm:$0xff]   ;;  %v2447_v14 = vld [vmem:[%s2657_s9 + $0x60] ss:$40 sps:$4 sm:$0xff]  }
  0x24   : > { %v2440_v6 = vld [vmem:[%s2657_s9 + $0x5c] ss:$40 sps:$4 sm:$0xff]   ;;  %v2443_v11 = vld [vmem:[%s2657_s9 + $0x58] ss:$40 sps:$4 sm:$0xff]   ;;  %v2449_v13 = vld [vmem:[%s3105_s1 + $0x230] sm:$0xff]  }
  0x25   : > { %2348 = vmatpush3.bf16.msra.mxu1 %v2373_v15  ;;  %2091 = vmatpush3.bf16.msra.mxu0 %v2373_v15  ;;  %v2442_v8 = vld [vmem:[%s3105_s1 + $0x238] sm:$0xff]   ;;  %v2450_v15 = vld [vmem:[%s2657_s9 + $0xac] ss:$40 sps:$4 sm:$0xff]  }
  0x26   : > { %2341 = vmatprep.subr.bf16.mxu1 %v2374_v16  ;;  %2092 = vmatprep.subr.bf16.mxu0 %v2374_v16  ;;  %v2453_v16 = vld [vmem:[%s2657_s9 + $0xb4] ss:$40 sps:$4 sm:$0xff]  }
  0x29   : > { %2349 = vmatpush3.bf16.msra.mxu1 %v2375_v17  ;;  %2093 = vmatpush3.bf16.msra.mxu0 %v2375_v17  ;;  %v2455_v17 = vld [vmem:[%s3105_s1 + $0x1e8] sm:$0xff]  }
  0x2a   : > { %2142 = vmatprep.subr.bf16.mxu1 %v2382_v20  ;;  %2206 = vmatprep.subr.bf16.mxu0 %v2384_v21  ;;  %v2452_v20 = vld [vmem:[%s2657_s9 + $0xa8] ss:$40 sps:$4 sm:$0xff]  }
  0x2b   : > { %v2456_v21 = vld [vmem:[%s2657_s9 + $0xb0] ss:$40 sps:$4 sm:$0xff]  }
  0x2c   : > { %1347 = vmatmul.mubr.bf16.vlgmr.msra.gmra.mxu1 %v2376_v18  ;;  %1315 = vmatmul.mubr.bf16.vlgmr.msra.gmra.mxu0 %v2379_v19  ;;  %v2457_v18 = vld [vmem:[%s3105_s1 + $0x1a8] sm:$0xff]  }
  0x2d   : > { %2143 = vmatpush3.bf16.msra.mxu1 %v2383_v22  ;;  %2207 = vmatpush3.bf16.msra.mxu0 %v2385_v23  ;;  %v2458_v19 = vld [vmem:[%s3105_s1 + $0x228] sm:$0xff]   ;;  %v2459_v22 = vld [vmem:[%s2657_s9 + $0xfc] ss:$40 sps:$4 sm:$0xff]  }
  0x2e   : > { %2144 = vmatprep.subr.bf16.mxu1 %v2386_v24  ;;  %2208 = vmatprep.subr.bf16.mxu0 %v2388_v25  ;;  %v2464_v23 = vld [vmem:[%s3105_s1 + $0x1e0] sm:$0xff]  }
  0x2f   : > { %1354 = vmatprep.mubr.bf16.mxu1 %v2390_v26  ;;  %1322 = vmatprep.mubr.bf16.mxu0 %v2392_v28  ;;  %v2462_v24 = vld [vmem:[%s2657_s9 + $0x104] ss:$40 sps:$4 sm:$0xff]   ;;  %v2465_v28 = vld [vmem:[%s2657_s9 + $0x100] ss:$40 sps:$4 sm:$0xff]  }
  0x30   : > { %v2466_v25 = vld [vmem:[%s3105_s1 + $0x1a0] sm:$0xff]  }
  0x31   : > { %2145 = vmatpush3.bf16.msra.mxu1 %v2387_v27  ;;  %2209 = vmatpush3.bf16.msra.mxu0 %v2389_v29  ;;  %v2467_v26 = vld [vmem:[%s3105_s1 + $0x220] sm:$0xff]   ;;  %v2470_v29 = vld [vmem:[%s3105_s1 + $0x218] sm:$0xff]  }
  0x32   : > { %2146 = vmatprep.subr.bf16.mxu1 %v2395_v30  ;;  %2210 = vmatprep.subr.bf16.mxu0 %v2398_v32  ;;  %v2461_v27 = vld [vmem:[%s2657_s9 + $0xf8] ss:$40 sps:$4 sm:$0xff]   ;;  %v2468_v30 = vld [vmem:[%s2657_s9 + $0x14c] ss:$40 sps:$4 sm:$0xff]  }
  0x33   : > { %v2476_v32 = vld [vmem:[%s3105_s1 + $0x198] sm:$0xff]  }
  0x34   : > { %1355 = vmatmul.mubr.bf16.gmra.mxu1 %v2394_v31  ;;  %1323 = vmatmul.mubr.bf16.gmra.mxu0 %v2396_v33  ;;  %v2474_v31 = vld [vmem:[%s3105_s1 + $0x1d8] sm:$0xff]  }
  0x35   : > { %2147 = vmatpush3.bf16.msra.mxu1 %v2397_v34  ;;  %2211 = vmatpush3.bf16.msra.mxu0 %v2399_v35  ;;  %v2472_v33 = vld [vmem:[%s2657_s9 + $0x154] ss:$40 sps:$4 sm:$0xff]  }
  0x36   : > { %2148 = vmatprep.subr.bf16.mxu1 %v2400_v36  ;;  %2212 = vmatprep.subr.bf16.mxu0 %v2402_v37  ;;  %v2477_v34 = vld [vmem:[%s3105_s1 + $0x210] sm:$0xff]  }
  0x37   : > { %1362 = vmatprep.mubr.bf16.mxu1 %v2404_v38  ;;  %1330 = vmatprep.mubr.bf16.mxu0 %v2406_v40  ;;  %v2483_v35 = vld [vmem:[%s3105_s1 + $0x1d0] sm:$0xff]   ;;  %v2486_v38 = vld [vmem:[%s3105_s1 + $0x208] sm:$0xff]   ;;  %v2478_v40 = vld [vmem:[%s2657_s9 + $0x19c] ss:$40 sps:$4 sm:$0xff]  }
  0x38   : > { %v2471_v36 = vld [vmem:[%s2657_s9 + $0x148] ss:$40 sps:$4 sm:$0xff]  }
  0x39   : > { %2149 = vmatpush3.bf16.msra.mxu1 %v2401_v39  ;;  %2213 = vmatpush3.bf16.msra.mxu0 %v2403_v41  ;;  %v2485_v37 = vld [vmem:[%s3105_s1 + $0x190] sm:$0xff]   ;;  %v2481_v41 = vld [vmem:[%s2657_s9 + $0x1a4] ss:$40 sps:$4 sm:$0xff]  }
  0x3a   : > { %2150 = vmatprep.subr.bf16.mxu1 %v2409_v42  ;;  %2214 = vmatprep.subr.bf16.mxu0 %v2412_v45  ;;  %v2475_v39 = vld [vmem:[%s2657_s9 + $0x150] ss:$40 sps:$4 sm:$0xff]   ;;  %v2492_v42 = vld [vmem:[%s3105_s1 + $0x1c8] sm:$0xff]  }
  0x3b   : > { %v2496_v45 = vld [vmem:[%s3105_s1 + $0x250] sm:$0xff]  }
  0x3c   : > { %1363 = vmatmul.mubr.bf16.gmra.mxu1 %v2408_v43  ;;  %1331 = vmatmul.mubr.bf16.gmra.mxu0 %v2410_v44  ;;  %v2493_v43 = vld [vmem:[%s3105_s1 + $0x200] sm:$0xff]   ;;  %v2495_v44 = vld [vmem:[%s3105_s1 + $0x188] sm:$0xff]  }
  0x3d   : > { %2151 = vmatpush3.bf16.msra.mxu1 %v2411_v46  ;;  %2215 = vmatpush3.bf16.msra.mxu0 %v2413_v47  ;;  %v2480_v46 = vld [vmem:[%s2657_s9 + $0x198] ss:$40 sps:$4 sm:$0xff]  }
  0x3e   : > { %2152 = vmatprep.subr.bf16.mxu1 %v2414_v48  ;;  %2216 = vmatprep.subr.bf16.mxu0 %v2416_v49  ;;  %v2484_v47 = vld [vmem:[%s2657_s9 + $0x1a0] ss:$40 sps:$4 sm:$0xff]   ;;  %v2487_v48 = vld [vmem:[%s2657_s9 + $0x1ec] ss:$40 sps:$4 sm:$0xff]  }
  0x3f   : > { %1370 = vmatprep.mubr.bf16.mxu1 %v2418_v50  ;;  %1338 = vmatprep.mubr.bf16.mxu0 %v2420_v51  ;;  %v2490_v49 = vld [vmem:[%s2657_s9 + $0x1f4] ss:$40 sps:$4 sm:$0xff]   ;;  %v2502_v50 = vld [vmem:[%s3105_s1 + $0x1c0] sm:$0xff]  }
  0x40   : > { %v2504_v51 = vld [vmem:[%s3105_s1 + $0x180] sm:$0xff]  }
  0x41   : > { %2153 = vmatpush3.bf16.msra.mxu1 %v2415_v52  ;;  %2217 = vmatpush3.bf16.msra.mxu0 %v2417_v53  ;;  %v2505_v52 = vld [vmem:[%s3105_s1 + $0x248] sm:$0xff]   ;;  %v2506_v53 = vld [vmem:[%s3105_s1 + $0x240] sm:$0xff]  }
  0x42   : > { %2154 = vmatprep.subr.bf16.mxu1 %v2423_v54  ;;  %2218 = vmatprep.subr.bf16.mxu0 %v2426_v57  ;;  %v2489_v54 = vld [vmem:[%s2657_s9 + $0x1e8] ss:$40 sps:$4 sm:$0xff]   ;;  %v2500_v57 = vld [vmem:[%s2657_s9 + $0x244] ss:$40 sps:$4 sm:$0xff]  }
  0x44   : > { %1371 = vmatmul.mubr.bf16.gmra.mxu1 %v2422_v55  ;;  %1339 = vmatmul.mubr.bf16.gmra.mxu0 %v2424_v56  ;;  %v2494_v55 = vld [vmem:[%s2657_s9 + $0x1f0] ss:$40 sps:$4 sm:$0xff]   ;;  %v2497_v56 = vld [vmem:[%s2657_s9 + $0x23c] ss:$40 sps:$4 sm:$0xff]  }
  0x45   : > { %2155 = vmatpush3.bf16.msra.mxu1 %v2425_v58  ;;  %2219 = vmatpush3.bf16.msra.mxu0 %v2427_v59  ;;  %v2499_v58 = vld [vmem:[%s2657_s9 + $0x238] ss:$40 sps:$4 sm:$0xff]  }
  0x46   : > { %2156 = vmatprep.subr.bf16.mxu1 %v2428_v60  ;;  %2220 = vmatprep.subr.bf16.mxu0 %v2430_v61  ;;  %v2503_v59 = vld [vmem:[%s2657_s9 + $0x240] ss:$40 sps:$4 sm:$0xff]   ;;  %v2509_v60 = vld [vmem:[%s2657_s9 + $0x1c] ss:$40 sps:$4 sm:$0xff]  }
  0x47   : > { %1411 = vmatprep.mubr.bf16.mxu1 %v2434_v0  ;;  %1508 = vmatprep.mubr.bf16.mxu0 %v2437_v3  ;;  %v2512_v61 = vld [vmem:[%s2657_s9 + $0x24] ss:$40 sps:$4 sm:$0xff]   ;;  %v2518_v3 = vld [vmem:[%s2657_s9 + $0x70] ss:$40 sps:$4 sm:$0xff]  }
  0x48   : > { %v2513_v0 = vld [vmem:[%s2657_s9 + $0x6c] ss:$40 sps:$4 sm:$0xff]  }
  0x49   : > { %2157 = vmatpush3.bf16.msra.mxu1 %v2429_v62  ;;  %2221 = vmatpush3.bf16.msra.mxu0 %v2431_v63  ;;  %v2507_v62 = vld [vmem:[%s2657_s9 + $0x18] ss:$40 sps:$4 sm:$0xff]  }
  0x4a   : > { %2270 = vmatprep.subr.bf16.mxu1 %v2438_v4  ;;  %1670 = vmatprep.subr.bf16.mxu0 %v2595_v7  ;;  %v2510_v63 = vld [vmem:[%s2657_s9 + $0x20] ss:$40 sps:$4 sm:$0xff]   ;;  %v2519_v4 = vld [vmem:[%s2657_s9 + $0xbc] ss:$40 sps:$4 sm:$0xff]  }
  0x4c   : > { %1412 = vmatmul.mubr.bf16.vlgmr.msra.gmra.mxu1 %v2432_v1  ;;  %1509 = vmatmul.mubr.bf16.vlgmr.msra.gmra.mxu0 %v2435_v2  ;;  %v2516_v1 = vld [vmem:[%s2657_s9 + $0x74] ss:$40 sps:$4 sm:$0xff]   ;;  %v2515_v2 = vld [vmem:[%s2657_s9 + $0x68] ss:$40 sps:$4 sm:$0xff]  }
  0x4d   : > { %2271 = vmatpush3.bf16.msra.mxu1 %v2439_v5  ;;  %1419 = vmatprep.mubr.bf16.mxu1 %v2440_v6  ;;  %v2522_v5 = vld [vmem:[%s2657_s9 + $0xc4] ss:$40 sps:$4 sm:$0xff]   ;;  %v2521_v6 = vld [vmem:[%s2657_s9 + $0xb8] ss:$40 sps:$4 sm:$0xff]  }
  0x4e   : > { %1671 = vmatpush1.bf16.msra.mxu0 %v2442_v8  ;;  %1516 = vmatprep.mubr.bf16.mxu0 %v2444_v9  ;;  %v2525_v8 = vld [vmem:[%s2657_s9 + $0x10c] ss:$40 sps:$4 sm:$0xff]  }
  0x4f   : > { %2272 = vmatprep.subr.bf16.mxu1 %v2446_v10  ;;  %1672 = vmatprep.subr.bf16.mxu0 %v2595_v7  ;;  %v2528_v9 = vld [vmem:[%s2657_s9 + $0x114] ss:$40 sps:$4 sm:$0xff]   ;;  %v2527_v10 = vld [vmem:[%s2657_s9 + $0x108] ss:$40 sps:$4 sm:$0xff]  }
  0x51   : > { %2273 = vmatpush3.bf16.msra.mxu1 %v2448_v12  ;;  %v2531_v12 = vld [vmem:[%s2657_s9 + $0x15c] ss:$40 sps:$4 sm:$0xff]  }
  0x52   : > { %1673 = vmatpush1.bf16.msra.mxu0 %v2449_v13  ;;  %2274 = vmatprep.subr.bf16.mxu1 %v2455_v17  ;;  %v2534_v13 = vld [vmem:[%s2657_s9 + $0x164] ss:$40 sps:$4 sm:$0xff]   ;;  %v2540_v17 = vld [vmem:[%s2657_s9 + $0x1b4] ss:$40 sps:$4 sm:$0xff]  }
  0x53   : > { %1674 = vmatprep.subr.bf16.mxu0 %v2595_v7 }
  0x54   : > { %1420 = vmatmul.mubr.bf16.gmra.mxu1 %v2443_v11  ;;  %1517 = vmatmul.mubr.bf16.gmra.mxu0 %v2447_v14  ;;  %v2530_v11 = vld [vmem:[%s2657_s9 + $0x110] ss:$40 sps:$4 sm:$0xff]  }
  0x55   : > { %1427 = vmatprep.mubr.bf16.mxu1 %v2450_v15  ;;  %1524 = vmatprep.mubr.bf16.mxu0 %v2453_v16  ;;  %v2533_v14 = vld [vmem:[%s2657_s9 + $0x158] ss:$40 sps:$4 sm:$0xff]   ;;  %v2537_v16 = vld [vmem:[%s2657_s9 + $0x1ac] ss:$40 sps:$4 sm:$0xff]  }
  0x56   : > { %2275 = vmatpush3.bf16.msra.mxu1 %v2457_v18  ;;  %1675 = vmatpush1.bf16.msra.mxu0 %v2458_v19  ;;  %v2536_v15 = vld [vmem:[%s2657_s9 + $0x160] ss:$40 sps:$4 sm:$0xff]   ;;  %v2542_v19 = vld [vmem:[%s2657_s9 + $0x1b0] ss:$40 sps:$4 sm:$0xff]  }
  0x57   : > { %1676 = vmatprep.subr.bf16.mxu0 %v2595_v7  ;;  %2276 = vmatprep.subr.bf16.mxu1 %v2464_v23  ;;  %v2539_v18 = vld [vmem:[%s2657_s9 + $0x1a8] ss:$40 sps:$4 sm:$0xff]  }
  0x58   : > { %v2548_v23 = vld [vmem:[%s2657_s9 + $0x200] ss:$40 sps:$4 sm:$0xff]  }
  0x5a   : > { %2277 = vmatpush3.bf16.msra.mxu1 %v2466_v25  ;;  %1677 = vmatpush1.bf16.msra.mxu0 %v2467_v26  ;;  %v2552_v25 = vld [vmem:[%s2657_s9 + $0x254] ss:$40 sps:$4 sm:$0xff]   ;;  %v2551_v26 = vld [vmem:[%s2657_s9 + $0x248] ss:$40 sps:$4 sm:$0xff]  }
  0x5b   : > { %1678 = vmatprep.subr.bf16.mxu0 %v2595_v7  ;;  %2278 = vmatprep.subr.bf16.mxu1 %v2474_v31 }
  0x5c   : > { %1428 = vmatmul.mubr.bf16.gmra.mxu1 %v2452_v20  ;;  %1525 = vmatmul.mubr.bf16.gmra.mxu0 %v2456_v21  ;;  %v2543_v20 = vld [vmem:[%s2657_s9 + $0x1fc] ss:$40 sps:$4 sm:$0xff]  }
  0x5d   : > { %1435 = vmatprep.mubr.bf16.mxu1 %v2459_v22  ;;  %1532 = vmatprep.mubr.bf16.mxu0 %v2462_v24  ;;  %v2546_v21 = vld [vmem:[%s2657_s9 + $0x204] ss:$40 sps:$4 sm:$0xff]   ;;  %v2545_v22 = vld [vmem:[%s2657_s9 + $0x1f8] ss:$40 sps:$4 sm:$0xff]  }
  0x5e   : > { %1679 = vmatpush1.bf16.msra.mxu0 %v2470_v29  ;;  %2279 = vmatpush3.bf16.msra.mxu1 %v2476_v32  ;;  %v2549_v24 = vld [vmem:[%s2657_s9 + $0x24c] ss:$40 sps:$4 sm:$0xff]  }
  0x5f   : > { %1680 = vmatprep.subr.bf16.mxu0 %v2595_v7  ;;  %2280 = vmatprep.subr.bf16.mxu1 %v2483_v35 }
  0x62   : > { %1681 = vmatpush1.bf16.msra.mxu0 %v2477_v34  ;;  %2281 = vmatpush3.bf16.msra.mxu1 %v2485_v37 }
  0x63   : > { %1682 = vmatprep.subr.bf16.mxu0 %v2595_v7  ;;  %2282 = vmatprep.subr.bf16.mxu1 %v2492_v42 }
  0x64   : > { %1436 = vmatmul.mubr.bf16.gmra.mxu1 %v2461_v27  ;;  %1533 = vmatmul.mubr.bf16.gmra.mxu0 %v2465_v28  ;;  %v2554_v27 = vld [vmem:[%s2657_s9 + $0x250] ss:$40 sps:$4 sm:$0xff]  }
  0x65   : > { %1443 = vmatprep.mubr.bf16.mxu1 %v2468_v30  ;;  %1540 = vmatprep.mubr.bf16.mxu0 %v2472_v33 }
  0x66   : > { %1683 = vmatpush1.bf16.msra.mxu0 %v2486_v38  ;;  %2283 = vmatpush3.bf16.msra.mxu1 %v2495_v44 }
  0x67   : > { %1684 = vmatprep.subr.bf16.mxu0 %v2595_v7  ;;  %2284 = vmatprep.subr.bf16.mxu1 %v2502_v50 }
  0x6a   : > { %1685 = vmatpush1.bf16.msra.mxu0 %v2493_v43  ;;  %2285 = vmatpush3.bf16.msra.mxu1 %v2504_v51 }
  0x6b   : > { %1696 = vmatprep.subr.bf16.mxu0 %v2595_v7 }
  0x6c   : > { %1444 = vmatmul.mubr.bf16.gmra.mxu1 %v2471_v36  ;;  %1541 = vmatmul.mubr.bf16.gmra.mxu0 %v2475_v39 }
  0x6d   : > { %1451 = vmatprep.mubr.bf16.mxu1 %v2478_v40  ;;  %1548 = vmatprep.mubr.bf16.mxu0 %v2481_v41 }
  0x6e   : > { %1697 = vmatpush2.bf16.msra.mxu0 %v2496_v45 }
  0x6f   : > { %1698 = vmatprep.subr.bf16.mxu0 %v2595_v7 }
  0x72   : > { %1699 = vmatpush2.bf16.msra.mxu0 %v2505_v52 }
  0x73   : > { %1700 = vmatprep.subr.bf16.mxu0 %v2595_v7  ;;  %v2524_v7 = vld [vmem:[%s2657_s9 + $0xc0] ss:$40 sps:$4 sm:$0xff]  }
  0x74   : > { %1452 = vmatmul.mubr.bf16.gmra.mxu1 %v2480_v46  ;;  %1549 = vmatmul.mubr.bf16.gmra.mxu0 %v2484_v47 }
  0x75   : > { %1459 = vmatprep.mubr.bf16.mxu1 %v2487_v48  ;;  %1556 = vmatprep.mubr.bf16.mxu0 %v2490_v49 }
  0x76   : > { %1701 = vmatpush2.bf16.msra.mxu0 %v2506_v53 }
  0x7c   : > { %1460 = vmatmul.mubr.bf16.gmra.mxu1 %v2489_v54  ;;  %1557 = vmatmul.mubr.bf16.gmra.mxu0 %v2494_v55 }
  0x7d   : > { %1467 = vmatprep.mubr.bf16.mxu1 %v2497_v56  ;;  %1564 = vmatprep.mubr.bf16.mxu0 %v2500_v57 }
  0x84   : > { %1468 = vmatmul.mubr.bf16.gmra.mxu1 %v2499_v58  ;;  %1565 = vmatmul.mubr.bf16.gmra.mxu0 %v2503_v59 }
  0x85   : > { %1605 = vmatprep.mubr.bf16.mxu1 %v2509_v60  ;;  %2068 = vmatprep.mubr.msk.bf16.mxu0 %vm1257_vm0, %v2512_v61 }
  0x8c   : > { %1606 = vmatmul.mubr.bf16.vlgmr.msra.gmra.mxu1 %v2507_v62  ;;  %1703 = vmatmul.mubr.bf16.vlgmr.msra.gmra.mxu0 %v2510_v63 }
  0x8d   : > { %1613 = vmatprep.mubr.bf16.mxu1 %v2513_v0  ;;  %2069 = vmatprep.mubr.msk.bf16.mxu0 %vm1257_vm0, %v2516_v1 }
  0x94   : > { %1614 = vmatmul.mubr.bf16.gmra.mxu1 %v2515_v2  ;;  %1711 = vmatmul.mubr.bf16.gmra.mxu0 %v2518_v3 }
  0x95   : > { %1621 = vmatprep.mubr.bf16.mxu1 %v2519_v4  ;;  %2070 = vmatprep.mubr.msk.bf16.mxu0 %vm1257_vm0, %v2522_v5 }
  0x9c   : > { %1622 = vmatmul.mubr.bf16.gmra.mxu1 %v2521_v6  ;;  %1719 = vmatmul.mubr.bf16.gmra.mxu0 %v2524_v7 }
  0x9d   : > { %1629 = vmatprep.mubr.bf16.mxu1 %v2525_v8  ;;  %2071 = vmatprep.mubr.msk.bf16.mxu0 %vm1257_vm0, %v2528_v9 }
  0xa4   : > { %1630 = vmatmul.mubr.bf16.gmra.mxu1 %v2527_v10  ;;  %1727 = vmatmul.mubr.bf16.gmra.mxu0 %v2530_v11 }
  0xa5   : > { %1637 = vmatprep.mubr.bf16.mxu1 %v2531_v12  ;;  %2072 = vmatprep.mubr.msk.bf16.mxu0 %vm1257_vm0, %v2534_v13 }
  0xac   : > { %1638 = vmatmul.mubr.bf16.gmra.mxu1 %v2533_v14  ;;  %1735 = vmatmul.mubr.bf16.gmra.mxu0 %v2536_v15  ;;  %v2979_v14 = vld [vmem:[%s3106_s2] ss:$0 sm:$0xff] }
  0xad   : > { %1645 = vmatprep.mubr.bf16.mxu1 %v2537_v16  ;;  %2073 = vmatprep.mubr.msk.bf16.mxu0 %vm1257_vm0, %v2540_v17 }
  0xb4   : > { %1646 = vmatmul.mubr.bf16.gmra.mxu1 %v2539_v18  ;;  %1743 = vmatmul.mubr.bf16.gmra.mxu0 %v2542_v19 }
  0xb5   : > { %1653 = vmatprep.mubr.bf16.mxu1 %v2543_v20  ;;  %2074 = vmatprep.mubr.msk.bf16.mxu0 %vm1257_vm0, %v2546_v21 }
  0xbc   : > { %1654 = vmatmul.mubr.bf16.gmra.mxu1 %v2545_v22  ;;  %1751 = vmatmul.mubr.bf16.gmra.mxu0 %v2548_v23 }
  0xbd   : > { %1661 = vmatprep.mubr.bf16.mxu1 %v2549_v24  ;;  %2075 = vmatprep.mubr.msk.bf16.mxu0 %vm1257_vm0, %v2552_v25 }
  0xc4   : > { %1662 = vmatmul.mubr.bf16.gmra.mxu1 %v2551_v26  ;;  %1759 = vmatmul.mubr.bf16.gmra.mxu0 %v2554_v27 }
  0xec   : > { %v2118_v28 = vpop.f32.mrf.mxu1  ;;  %v2094_v29 = vpop.f32.mrf.mxu0 }
  0xee   : > { %v2119_v30 = vpop.f32.mrf.mxu1  ;;  %v2095_v31 = vpop.f32.mrf.mxu0 }
  0xef   : > { %v2956_v32 = vadd.f32 %v2119_v30, %v2118_v28  ;;  %v2096_v33 = vadd.f32 %v2095_v31, %v2094_v29 }
  0xf0   : > { %v2121_v34 = vpop.f32.mrf.mxu1  ;;  %v2097_v35 = vpop.f32.mrf.mxu0 }
  0xf1   : > { %v1317_v17 = vadd.f32 %v2096_v33, %v2979_v14 }
  0xf2   : > { %v2122_v36 = vpop.f32.mrf.mxu1  ;;  %v2098_v37 = vpop.f32.mrf.mxu0 }
  0xf3   : > { %v2958_v38 = vadd.f32 %v2122_v36, %v2121_v34  ;;  %v2099_v39 = vadd.f32 %v2098_v37, %v2097_v35 }
  0xf4   : > { %v2124_v40 = vpop.f32.mrf.mxu1  ;;  %v2100_v41 = vpop.f32.mrf.mxu0 }
  0xf5   : > { %v1320_v25 = vadd.f32 %v2099_v39, %v2979_v14 }
  0xf6   : > { %v2125_v42 = vpop.f32.mrf.mxu1  ;;  %v2101_v43 = vpop.f32.mrf.mxu0 }
  0xf7   : > { %v2960_v44 = vadd.f32 %v2125_v42, %v2124_v40  ;;  %v2102_v45 = vadd.f32 %v2101_v43, %v2100_v41 }
  0xf8   : > { %v2127_v46 = vpop.f32.mrf.mxu1  ;;  %v2103_v47 = vpop.f32.mrf.mxu0 }
  0xf9   : > { %v1325_v33 = vadd.f32 %v2102_v45, %v2979_v14 }
  0xfa   : > { %v2128_v48 = vpop.f32.mrf.mxu1  ;;  %v2104_v49 = vpop.f32.mrf.mxu0 }
  0xfb   : > { %v2962_v50 = vadd.f32 %v2128_v48, %v2127_v46  ;;  %v2105_v51 = vadd.f32 %v2104_v49, %v2103_v47 }
  0xfc   : > { %v2130_v52 = vpop.f32.mrf.mxu1  ;;  %v2106_v53 = vpop.f32.mrf.mxu0 }
  0xfd   : > { %v1328_v47 = vadd.f32 %v2105_v51, %v2979_v14 }
  0xfe   : > { %v2131_v54 = vpop.f32.mrf.mxu1  ;;  %v2107_v55 = vpop.f32.mrf.mxu0 }
  0xff   : > { %v2964_v56 = vadd.f32 %v2131_v54, %v2130_v52  ;;  %v2108_v57 = vadd.f32 %v2107_v55, %v2106_v53 }
 0x100   : > { %v2133_v58 = vpop.f32.mrf.mxu1  ;;  %v2109_v59 = vpop.f32.mrf.mxu0 }
 0x102   : > { %v2134_v60 = vpop.f32.mrf.mxu1  ;;  %v2110_v61 = vpop.f32.mrf.mxu0 }
 0x103   : > { %v2966_v62 = vadd.f32 %v2134_v60, %v2133_v58  ;;  %v2111_v63 = vadd.f32 %v2110_v61, %v2109_v59  ;;  %v1333_v59 = vadd.f32 %v2108_v57, %v2979_v14 }
 0x104   : > { %v2136_v0 = vpop.f32.mrf.mxu1  ;;  %v2112_v1 = vpop.f32.mrf.mxu0 }
 0x106   : > { %v2137_v2 = vpop.f32.mrf.mxu1  ;;  %v2113_v3 = vpop.f32.mrf.mxu0 }
 0x107   : > { %v2968_v4 = vadd.f32 %v2137_v2, %v2136_v0  ;;  %v2970_v5 = vadd.f32 %v2113_v3, %v2112_v1 }
 0x108   : > { %v2139_v6 = vpop.f32.mrf.mxu1  ;;  %v2115_v7 = vpop.f32.mrf.mxu0 }
 0x10a   : > { %v2140_v8 = vpop.f32.mrf.mxu1  ;;  %v2116_v9 = vpop.f32.mrf.mxu0 }
 0x10b   : > { %v2972_v10 = vadd.f32 %v2140_v8, %v2139_v6  ;;  %v2974_v11 = vadd.f32 %v2116_v9, %v2115_v7  ;;  %v1336_v7 = vadd.f32 %v2111_v63, %v2979_v14 }
 0x10c   : > { %v2158_v12 = vpop.f32.mrf.mxu1  ;;  %v2222_v13 = vpop.f32.mrf.mxu0 }
 0x10e   : > { %v2159_v15 = vpop.f32.mrf.mxu1  ;;  %v2223_v16 = vpop.f32.mrf.mxu0 }
 0x10f   : > { %v2160_v18 = vadd.f32 %v2159_v15, %v2158_v12  ;;  %v2224_v19 = vadd.f32 %v2223_v16, %v2222_v13 }
 0x110   : > { %v2161_v20 = vpop.f32.mrf.mxu1  ;;  %v2225_v21 = vpop.f32.mrf.mxu0 }
 0x111   : > { %v1414_v22 = vadd.f32 %v2160_v18, %v1317_v17  ;;  %v1341_v18 = vadd.f32 %v2970_v5, %v2979_v14 }
 0x112   : > { %v2162_v23 = vpop.f32.mrf.mxu1  ;;  %v2226_v24 = vpop.f32.mrf.mxu0 }
 0x113   : > { %v2983_v26 = vadd.f32 %v2224_v19, %v1414_v22  ;;  %v2163_v27 = vadd.f32 %v2162_v23, %v2161_v20  ;;  %v2227_v31 = vadd.f32 %v2226_v24, %v2225_v21 }
 0x114   : > { %v2164_v28 = vpop.f32.mrf.mxu1  ;;  %v2228_v29 = vpop.f32.mrf.mxu0 }
 0x115   : > { %v1417_v30 = vadd.f32 %v2163_v27, %v1320_v25  ;;  %v1344_v27 = vadd.f32 %v2974_v11, %v2979_v14 }
 0x116   : > { %v2165_v34 = vpop.f32.mrf.mxu1  ;;  %v2229_v35 = vpop.f32.mrf.mxu0 }
 0x117   : > { %v2986_v36 = vadd.f32 %v2227_v31, %v1417_v30  ;;  %v2166_v37 = vadd.f32 %v2165_v34, %v2164_v28  ;;  %v2230_v40 = vadd.f32 %v2229_v35, %v2228_v29 }
 0x118   : > { %v2167_v41 = vpop.f32.mrf.mxu1  ;;  %v2231_v42 = vpop.f32.mrf.mxu0 }
 0x119   : > { %v1422_v43 = vadd.f32 %v2166_v37, %v1325_v33  ;;  %v1349_v37 = vadd.f32 %v2956_v32, %v2979_v14 }
 0x11a   : > { %v2168_v46 = vpop.f32.mrf.mxu1  ;;  %v2232_v39 = vpop.f32.mrf.mxu0 }
 0x11b   : > { %v2989_v48 = vadd.f32 %v2230_v40, %v1422_v43  ;;  %v2169_v49 = vadd.f32 %v2168_v46, %v2167_v41  ;;  %v2233_v55 = vadd.f32 %v2232_v39, %v2231_v42 }
 0x11c   : > { %v2170_v52 = vpop.f32.mrf.mxu1  ;;  %v2234_v53 = vpop.f32.mrf.mxu0 }
 0x11d   : > { %v1425_v54 = vadd.f32 %v2169_v49, %v1328_v47  ;;  %v1352_v49 = vadd.f32 %v2958_v38, %v2979_v14 }
 0x11e   : > { %v2171_v58 = vpop.f32.mrf.mxu1  ;;  %v2235_v45 = vpop.f32.mrf.mxu0 }
 0x11f   : > { %v2992_v60 = vadd.f32 %v2233_v55, %v1425_v54  ;;  %v2172_v61 = vadd.f32 %v2171_v58, %v2170_v52  ;;  %v2236_v0 = vadd.f32 %v2235_v45, %v2234_v53 }
 0x120   : > { %v2173_v1 = vpop.f32.mrf.mxu1  ;;  %v2237_v2 = vpop.f32.mrf.mxu0 }
 0x121   : > { %v1430_v3 = vadd.f32 %v2172_v61, %v1333_v59  ;;  %v1357_v61 = vadd.f32 %v2960_v44, %v2979_v14 }
 0x122   : > { %v2174_v6 = vpop.f32.mrf.mxu1  ;;  %v2238_v51 = vpop.f32.mrf.mxu0 }
 0x123   : > { %v2995_v8 = vadd.f32 %v2236_v0, %v1430_v3  ;;  %v2175_v9 = vadd.f32 %v2174_v6, %v2173_v1  ;;  %v2239_v16 = vadd.f32 %v2238_v51, %v2237_v2 }
 0x124   : > { %v2176_v12 = vpop.f32.mrf.mxu1  ;;  %v2240_v13 = vpop.f32.mrf.mxu0 }
 0x125   : > { %v1433_v15 = vadd.f32 %v2175_v9, %v1336_v7  ;;  %v1360_v9 = vadd.f32 %v2962_v50, %v2979_v14 }
 0x126   : > { %v2177_v17 = vpop.f32.mrf.mxu1  ;;  %v2241_v57 = vpop.f32.mrf.mxu0 }
 0x127   : > { %v2999_v19 = vadd.f32 %v2239_v16, %v1433_v15  ;;  %v2178_v20 = vadd.f32 %v2177_v17, %v2176_v12  ;;  %v2242_v21 = vadd.f32 %v2241_v57, %v2240_v13 }
 0x128   : > { %v2179_v22 = vpop.f32.mrf.mxu1  ;;  %v2243_v23 = vpop.f32.mrf.mxu0 }
 0x129   : > { %v1438_v24 = vadd.f32 %v2178_v20, %v1341_v18  ;;  %v1365_v20 = vadd.f32 %v2964_v56, %v2979_v14 }
 0x12a   : > { %v2180_v63 = vpop.f32.mrf.mxu1  ;;  %v2244_v25 = vpop.f32.mrf.mxu0 }
 0x12b   : > { %v3003_v28 = vadd.f32 %v2242_v21, %v1438_v24  ;;  %v2181_v29 = vadd.f32 %v2180_v63, %v2179_v22  ;;  %v2245_v35 = vadd.f32 %v2244_v25, %v2243_v23 }
 0x12c   : > { %v2182_v30 = vpop.f32.mrf.mxu1  ;;  %v2246_v31 = vpop.f32.mrf.mxu0 }
 0x12d   : > { %v1441_v34 = vadd.f32 %v2181_v29, %v1344_v27  ;;  %v1368_v29 = vadd.f32 %v2966_v62, %v2979_v14 }
 0x12e   : > { %v2183_v5 = vpop.f32.mrf.mxu1  ;;  %v2247_v33 = vpop.f32.mrf.mxu0 }
 0x12f   : > { %v3007_v40 = vadd.f32 %v2245_v35, %v1441_v34  ;;  %v2184_v41 = vadd.f32 %v2183_v5, %v2182_v30  ;;  %v2248_v42 = vadd.f32 %v2247_v33, %v2246_v31 }
 0x130   : > { %v2185_v43 = vpop.f32.mrf.mxu1  ;;  %v2249_v46 = vpop.f32.mrf.mxu0 }
 0x131   : > { %v1446_v39 = vadd.f32 %v2184_v41, %v1349_v37  ;;  %v1373_v41 = vadd.f32 %v2968_v4, %v2979_v14 }
 0x132   : > { %v2186_v11 = vpop.f32.mrf.mxu1  ;;  %v2250_v47 = vpop.f32.mrf.mxu0 }
 0x133   : > { %v3011_v52 = vadd.f32 %v2248_v42, %v1446_v39  ;;  %v2187_v53 = vadd.f32 %v2186_v11, %v2185_v43  ;;  %v2251_v45 = vadd.f32 %v2250_v47, %v2249_v46 }
 0x134   : > { %v2188_v54 = vpop.f32.mrf.mxu1  ;;  %v2252_v55 = vpop.f32.mrf.mxu0 }
 0x135   : > { %v1449_v58 = vadd.f32 %v2187_v53, %v1352_v49  ;;  %v1376_v53 = vadd.f32 %v2972_v10, %v2979_v14 }
 0x136   : > { %v2189_v32 = vpop.f32.mrf.mxu1  ;;  %v2253_v59 = vpop.f32.mrf.mxu0 }
 0x137   : > { %v3015_v0 = vadd.f32 %v2251_v45, %v1449_v58  ;;  %v2190_v1 = vadd.f32 %v2189_v32, %v2188_v54  ;;  %v2254_v2 = vadd.f32 %v2253_v59, %v2252_v55 }
 0x138   : > { %v2191_v3 = vpop.f32.mrf.mxu1  ;;  %v2255_v6 = vpop.f32.mrf.mxu0 }
 0x139   : > { %v1454_v51 = vadd.f32 %v2190_v1, %v1357_v61 }
 0x13a   : > { %v2192_v38 = vpop.f32.mrf.mxu1  ;;  %v2256_v7 = vpop.f32.mrf.mxu0 }
 0x13b   : > { %v3019_v12 = vadd.f32 %v2254_v2, %v1454_v51  ;;  %v2193_v13 = vadd.f32 %v2192_v38, %v2191_v3  ;;  %v2257_v57 = vadd.f32 %v2256_v7, %v2255_v6 }
 0x13c   : > { %v2194_v15 = vpop.f32.mrf.mxu1  ;;  %v2258_v16 = vpop.f32.mrf.mxu0 }
 0x13d   : > { %v1457_v17 = vadd.f32 %v2193_v13, %v1360_v9 }
 0x13e   : > { %v2195_v44 = vpop.f32.mrf.mxu1  ;;  %v2259_v18 = vpop.f32.mrf.mxu0 }
 0x13f   : > { %v3023_v21 = vadd.f32 %v2257_v57, %v1457_v17  ;;  %v2196_v22 = vadd.f32 %v2195_v44, %v2194_v15  ;;  %v2260_v23 = vadd.f32 %v2259_v18, %v2258_v16 }
 0x140   : > { %v2197_v24 = vpop.f32.mrf.mxu1  ;;  %v2261_v63 = vpop.f32.mrf.mxu0 }
 0x141   : > { %v1462_v25 = vadd.f32 %v2196_v22, %v1365_v20 }
 0x142   : > { %v2198_v50 = vpop.f32.mrf.mxu1  ;;  %v2262_v27 = vpop.f32.mrf.mxu0 }
 0x143   : > { %v3027_v30 = vadd.f32 %v2260_v23, %v1462_v25  ;;  %v2199_v31 = vadd.f32 %v2198_v50, %v2197_v24  ;;  %v2263_v33 = vadd.f32 %v2262_v27, %v2261_v63 }
 0x144   : > { %v2200_v34 = vpop.f32.mrf.mxu1  ;;  %v2264_v35 = vpop.f32.mrf.mxu0 }
 0x145   : > { %v1465_v5 = vadd.f32 %v2199_v31, %v1368_v29 }
 0x146   : > { %v2201_v56 = vpop.f32.mrf.mxu1  ;;  %v2265_v37 = vpop.f32.mrf.mxu0 }
 0x147   : > { %v3031_v42 = vadd.f32 %v2263_v33, %v1465_v5  ;;  %v2202_v43 = vadd.f32 %v2201_v56, %v2200_v34  ;;  %v2266_v46 = vadd.f32 %v2265_v37, %v2264_v35 }
 0x148   : > { %v2203_v39 = vpop.f32.mrf.mxu1  ;;  %v2267_v11 = vpop.f32.mrf.mxu0 }
 0x149   : > { %v1470_v47 = vadd.f32 %v2202_v43, %v1373_v41 }
 0x14a   : > { %v2204_v62 = vpop.f32.mrf.mxu1  ;;  %v2268_v49 = vpop.f32.mrf.mxu0 }
 0x14b   : > { %v3035_v54 = vadd.f32 %v2266_v46, %v1470_v47  ;;  %v2205_v55 = vadd.f32 %v2204_v62, %v2203_v39  ;;  %v2269_v59 = vadd.f32 %v2268_v49, %v2267_v11 }
 0x14c   : > { %v2286_v58 = vpop.f32.mrf.mxu1  ;;  %v1704_v45 = vpop.f32.mrf.mxu0 }
 0x14d   : > { %v1473_v32 = vadd.f32 %v2205_v55, %v1376_v53 }
 0x14e   : > { %v2287_v4 = vpop.f32.mrf.mxu1  ;;  %v1706_v61 = vpop.f32.mrf.mxu0 }
 0x14f   : > { %v3037_v1 = vadd.f32 %v2269_v59, %v1473_v32  ;;  %v2288_v2 = vadd.f32 %v2287_v4, %v2286_v58 }
 0x150   : > { %v2289_v3 = vpop.f32.mrf.mxu1  ;;  %v1707_v6 = vpop.f32.mrf.mxu0 }
 0x151   : > { %v1608_v51 = vadd.f32 %v2288_v2, %v2983_v26 }
 0x152   : > { %v2290_v38 = vpop.f32.mrf.mxu1  ;;  %v1709_v7 = vpop.f32.mrf.mxu0 }
 0x153   : > { %v1705_v9 = vadd.f32 %v1704_v45, %v1608_v51  ;;  %v2291_v10 = vadd.f32 %v2290_v38, %v2289_v3 }
 0x154   : > { %v2292_v14 = vpop.f32.mrf.mxu1  ;;  %v1712_v13 = vpop.f32.mrf.mxu0 }
 0x155   : > { %v1767_v15 = vand.u32 2147483647, %v1705_v9  ;;  %v1611_v16 = vadd.f32 %v2291_v10, %v2986_v36 }
 0x156   : > { %v2293_v17 = vpop.f32.mrf.mxu1  ;;  %v1714_v57 = vpop.f32.mrf.mxu0 }
 0x157   : > { %v1783_v44 = vadd.f32 1.0, %v1767_v15  ;;  %v1708_v18 = vadd.f32 %v1707_v6, %v1611_v16  ;;  %v2294_v20 = vadd.f32 %v2293_v17, %v2292_v14 }
 0x158   : > { %v2295_v22 = vpop.f32.mrf.mxu1  ;;  %v1715_v23 = vpop.f32.mrf.mxu0 }
 0x159   : > { %2555 = vrcp.f32 %v1783_v44  ;;  %v1768_v24 = vand.u32 2147483647, %v1708_v18  ;;  %v1616_v26 = vadd.f32 %v2294_v20, %v2989_v48 }
 0x15a   : > { %v2296_v63 = vpop.f32.mrf.mxu1  ;;  %v1717_v25 = vpop.f32.mrf.mxu0 }
 0x15b   : > { %v1784_v50 = vadd.f32 1.0, %v1768_v24  ;;  %v1713_v27 = vadd.f32 %v1712_v13, %v1616_v26  ;;  %v2297_v29 = vadd.f32 %v2296_v63, %v2295_v22 }
 0x15c   : > { %v2298_v31 = vpop.f32.mrf.mxu1  ;;  %v1720_v34 = vpop.f32.mrf.mxu0 }
 0x15d   : > { %2557 = vrcp.f32 %v1784_v50  ;;  %v1769_v36 = vand.u32 2147483647, %v1713_v27  ;;  %v1619_v35 = vadd.f32 %v2297_v29, %v2992_v60 }
 0x15e   : > { %v2299_v5 = vpop.f32.mrf.mxu1  ;;  %v1722_v33 = vpop.f32.mrf.mxu0 }
 0x15f   : > { %v1785_v56 = vadd.f32 1.0, %v1769_v36  ;;  %v1716_v37 = vadd.f32 %v1715_v23, %v1619_v35  ;;  %v2300_v41 = vadd.f32 %v2299_v5, %v2298_v31 }
 0x160   : > { %v2301_v43 = vpop.f32.mrf.mxu1  ;;  %v1723_v46 = vpop.f32.mrf.mxu0 }
 0x161   : > { %2559 = vrcp.f32 %v1785_v56  ;;  %v1770_v48 = vand.u32 2147483647, %v1716_v37  ;;  %v1624_v39 = vadd.f32 %v2300_v41, %v2995_v8 }
 0x162   : > { %v2302_v11 = vpop.f32.mrf.mxu1  ;;  %v1725_v47 = vpop.f32.mrf.mxu0 }
 0x163   : > { %v1786_v62 = vadd.f32 1.0, %v1770_v48  ;;  %v3045_v49 = vadd.f32 %v1720_v34, %v1624_v39  ;;  %v2303_v53 = vadd.f32 %v2302_v11, %v2301_v43 }
 0x164   : > { %v2304_v55 = vpop.f32.mrf.mxu1  ;;  %v1728_v60 = vpop.f32.mrf.mxu0 }
 0x165   : > { %2561 = vrcp.f32 %v1786_v62  ;;  %v1771_v58 = vand.u32 2147483647, %v3045_v49  ;;  %v1627_v45 = vadd.f32 %v2303_v53, %v2999_v19 }
 0x166   : > { %v2556_v32 = vpop.eup %2555  ;;  %v2305_v8 = vpop.f32.mrf.mxu1 }
 0x167   : > { %v1730_v59 = vpop.f32.mrf.mxu0  ;;  %v1815_v4 = vmul.f32 %v2556_v32, %v1705_v9  ;;  %v1787_v61 = vadd.f32 1.0, %v1771_v58  ;;  %v3054_v2 = vadd.f32 %v1723_v46, %v1627_v45  ;;  %v2306_v3 = vadd.f32 %v2305_v8, %v2304_v55 }
 0x168   : > { %v2307_v6 = vpop.f32.mrf.mxu1 }
 0x169   : > { %v1731_v51 = vpop.f32.mrf.mxu0  ;;  %1831 = vst [vmem:[%s3052_s28] sm:$0xff] %v1815_v4  ;;  %2563 = vrcp.f32 %v1787_v61  ;;  %v1772_v19 = vand.u32 2147483647, %v3054_v2  ;;  %v1632_v38 = vadd.f32 %v2306_v3, %v3003_v28 }
 0x16a   : > { %v2558_v7 = vpop.eup %2557  ;;  %v2308_v10 = vpop.f32.mrf.mxu1 }
 0x16b   : > { %v1733_v14 = vpop.f32.mrf.mxu0  ;;  %v1816_v13 = vmul.f32 %v2558_v7, %v1708_v18  ;;  %v1788_v15 = vadd.f32 1.0, %v1772_v19  ;;  %v3059_v16 = vadd.f32 %v1728_v60, %v1632_v38  ;;  %v2309_v9 = vadd.f32 %v2308_v10, %v2307_v6 }
 0x16c   : > { %v2310_v17 = vpop.f32.mrf.mxu1 }
 0x16d   : > { %v1736_v57 = vpop.f32.mrf.mxu0  ;;  %1832 = vst [vmem:[%s3052_s28 + $0x8] sm:$0xff] %v1816_v13  ;;  %2565 = vrcp.f32 %v1788_v15  ;;  %v1773_v44 = vand.u32 2147483647, %v3059_v16  ;;  %v1635_v20 = vadd.f32 %v2309_v9, %v3007_v40 }
 0x16e   : > { %v2560_v22 = vpop.eup %2559  ;;  %v2311_v23 = vpop.f32.mrf.mxu1 }
 0x16f   : > { %v1738_v28 = vpop.f32.mrf.mxu0  ;;  %v1817_v24 = vmul.f32 %v2560_v22, %v1713_v27  ;;  %v1789_v26 = vadd.f32 1.0, %v1773_v44  ;;  %v3064_v63 = vadd.f32 %v1731_v51, %v1635_v20  ;;  %v2312_v18 = vadd.f32 %v2311_v23, %v2310_v17 }
 0x170   : > { %v2313_v25 = vpop.f32.mrf.mxu1 }
 0x171   : > { %v1739_v50 = vpop.f32.mrf.mxu0  ;;  %1833 = vst [vmem:[%s3052_s28 + $0x10] sm:$0xff] %v1817_v24  ;;  %2567 = vrcp.f32 %v1789_v26  ;;  %v1774_v29 = vand.u32 2147483647, %v3064_v63  ;;  %v1640_v31 = vadd.f32 %v2312_v18, %v3011_v52 }
 0x172   : > { %v2562_v34 = vpop.eup %2561  ;;  %v2314_v36 = vpop.f32.mrf.mxu1 }
 0x173   : > { %v1741_v40 = vpop.f32.mrf.mxu0  ;;  %v1818_v35 = vmul.f32 %v2562_v34, %v1716_v37  ;;  %v1790_v5 = vadd.f32 1.0, %v1774_v29  ;;  %v3069_v33 = vadd.f32 %v1736_v57, %v1640_v31  ;;  %v2315_v27 = vadd.f32 %v2314_v36, %v2313_v25 }
 0x174   : > { %v2316_v56 = vpop.f32.mrf.mxu1 }
 0x175   : > { %v1744_v41 = vpop.f32.mrf.mxu0  ;;  %1834 = vst [vmem:[%s3052_s28 + $0x18] sm:$0xff] %v1818_v35  ;;  %2569 = vrcp.f32 %v1790_v5  ;;  %v1775_v43 = vand.u32 2147483647, %v3069_v33  ;;  %v1643_v46 = vadd.f32 %v2315_v27, %v3015_v0 }
 0x176   : > { %v2564_v48 = vpop.eup %2563  ;;  %v2317_v39 = vpop.f32.mrf.mxu1 }
 0x177   : > { %v1746_v52 = vpop.f32.mrf.mxu0  ;;  %v1819_v11 = vmul.f32 %v2564_v48, %v3045_v49  ;;  %v1791_v47 = vadd.f32 1.0, %v1775_v43  ;;  %v3075_v37 = vadd.f32 %v1739_v50, %v1643_v46  ;;  %v2318_v62 = vadd.f32 %v2317_v39, %v2316_v56 }
 0x178   : > { %v2319_v53 = vpop.f32.mrf.mxu1 }
 0x179   : > { %v1747_v55 = vpop.f32.mrf.mxu0  ;;  %1835 = vst [vmem:[%s3052_s28 + $0x20] sm:$0xff] %v1819_v11  ;;  %2571 = vrcp.f32 %v1791_v47  ;;  %v1776_v60 = vand.u32 2147483647, %v3075_v37  ;;  %v1648_v58 = vadd.f32 %v2318_v62, %v3019_v12 }
 0x17a   : > { %v2566_v45 = vpop.eup %2565  ;;  %v2320_v0 = vpop.f32.mrf.mxu1 }
 0x17b   : > { %v1749_v32 = vpop.f32.mrf.mxu0  ;;  %v1820_v8 = vmul.f32 %v2566_v45, %v3054_v2  ;;  %v1792_v59 = vadd.f32 1.0, %v1776_v60  ;;  %v1745_v49 = vadd.f32 %v1744_v41, %v1648_v58  ;;  %v2321_v4 = vadd.f32 %v2320_v0, %v2319_v53 }
 0x17c   : > { %v2322_v61 = vpop.f32.mrf.mxu1 }
 0x17d   : > { %v1752_v3 = vpop.f32.mrf.mxu0  ;;  %1836 = vst [vmem:[%s3052_s28 + $0x28] sm:$0xff] %v1820_v8  ;;  %2573 = vrcp.f32 %v1792_v59  ;;  %v1777_v6 = vand.u32 2147483647, %v1745_v49  ;;  %v1651_v51 = vadd.f32 %v2321_v4, %v3023_v21 }
 0x17e   : > { %v2568_v19 = vpop.eup %2567  ;;  %v2323_v38 = vpop.f32.mrf.mxu1 }
 0x17f   : > { %v1754_v7 = vpop.f32.mrf.mxu0  ;;  %v1821_v12 = vmul.f32 %v2568_v19, %v3059_v16  ;;  %v1793_v10 = vadd.f32 1.0, %v1777_v6  ;;  %v1748_v14 = vadd.f32 %v1747_v55, %v1651_v51  ;;  %v2324_v13 = vadd.f32 %v2323_v38, %v2322_v61 }
 0x180   : > { %v2325_v2 = vpop.f32.mrf.mxu1 }
 0x181   : > { %v1755_v15 = vpop.f32.mrf.mxu0  ;;  %1837 = vst [vmem:[%s3052_s28 + $0x30] sm:$0xff] %v1821_v12  ;;  %2575 = vrcp.f32 %v1793_v10  ;;  %v1778_v9 = vand.u32 2147483647, %v1748_v14  ;;  %v1656_v17 = vadd.f32 %v2324_v13, %v3027_v30 }
 0x182   : > { %v2570_v57 = vpop.eup %2569  ;;  %v2326_v44 = vpop.f32.mrf.mxu1 }
 0x183   : > { %v1757_v20 = vpop.f32.mrf.mxu0  ;;  %v1822_v21 = vmul.f32 %v2570_v57, %v3064_v63  ;;  %v1794_v22 = vadd.f32 1.0, %v1778_v9  ;;  %v1753_v23 = vadd.f32 %v1752_v3, %v1656_v17  ;;  %v2327_v28 = vadd.f32 %v2326_v44, %v2325_v2 }
 0x184   : > { %v2328_v16 = vpop.f32.mrf.mxu1 }
 0x185   : > { %v1760_v24 = vpop.f32.mrf.mxu0  ;;  %1838 = vst [vmem:[%s3052_s28 + $0x38] sm:$0xff] %v1822_v21  ;;  %2577 = vrcp.f32 %v1794_v22  ;;  %v1779_v26 = vand.u32 2147483647, %v1753_v23  ;;  %v1659_v18 = vadd.f32 %v2327_v28, %v3031_v42 }
 0x186   : > { %v2572_v25 = vpop.eup %2571  ;;  %v2329_v50 = vpop.f32.mrf.mxu1 }
 0x187   : > { %v1762_v29 = vpop.f32.mrf.mxu0  ;;  %v1823_v30 = vmul.f32 %v2572_v25, %v3069_v33  ;;  %v1795_v31 = vadd.f32 1.0, %v1779_v26  ;;  %v1756_v34 = vadd.f32 %v1755_v15, %v1659_v18  ;;  %v2330_v63 = vadd.f32 %v2329_v50, %v2328_v16 }
 0x188   : > { %v2331_v36 = vpop.f32.mrf.mxu1 }
 0x189   : > { %v1763_v40 = vpop.f32.mrf.mxu0  ;;  %1839 = vst [vmem:[%s3052_s28 + $0x40] sm:$0xff] %v1823_v30  ;;  %2579 = vrcp.f32 %v1795_v31  ;;  %v1780_v35 = vand.u32 2147483647, %v1756_v34  ;;  %v1664_v5 = vadd.f32 %v2330_v63, %v3035_v54 }
 0x18a   : > { %v2574_v27 = vpop.eup %2573  ;;  %v2332_v56 = vpop.f32.mrf.mxu1 }
 0x18b   : > { %v1765_v42 = vpop.f32.mrf.mxu0  ;;  %v1824_v41 = vmul.f32 %v2574_v27, %v3075_v37  ;;  %v1796_v43 = vadd.f32 1.0, %v1780_v35  ;;  %v1761_v46 = vadd.f32 %v1760_v24, %v1664_v5  ;;  %v2333_v33 = vadd.f32 %v2332_v56, %v2331_v36 }
 0x18d   : > { %1840 = vst [vmem:[%s3052_s28 + $0x48] sm:$0xff] %v1824_v41  ;;  %2581 = vrcp.f32 %v1796_v43  ;;  %v1781_v48 = vand.u32 2147483647, %v1761_v46  ;;  %v1667_v39 = vadd.f32 %v2333_v33, %v3037_v1 }
 0x18e   : > { %v2576_v52 = vpop.eup %2575 }
 0x18f   : > { %v1825_v11 = vmul.f32 %v2576_v52, %v1745_v49  ;;  %v1797_v54 = vadd.f32 1.0, %v1781_v48  ;;  %v1764_v47 = vadd.f32 %v1763_v40, %v1667_v39 }
 0x191   : > { %1841 = vst [vmem:[%s3052_s28 + $0x50] sm:$0xff] %v1825_v11  ;;  %2583 = vrcp.f32 %v1797_v54  ;;  %v1782_v62 = vand.u32 2147483647, %v1764_v47 }
 0x192   : > { %v2578_v37 = vpop.eup %2577 }
 0x193   : > { %v1826_v53 = vmul.f32 %v2578_v37, %v1748_v14  ;;  %v1798_v55 = vadd.f32 1.0, %v1782_v62 }
 0x195   : > { %1842 = vst [vmem:[%s3052_s28 + $0x58] sm:$0xff] %v1826_v53  ;;  %2585 = vrcp.f32 %v1798_v55 }
 0x196   : > { %v2580_v60 = vpop.eup %2579 }
 0x197   : > { %v1827_v58 = vmul.f32 %v2580_v60, %v1753_v23 }
 0x199   : > { %1843 = vst [vmem:[%s3052_s28 + $0x60] sm:$0xff] %v1827_v58 }
 0x19a   : > { %v2582_v45 = vpop.eup %2581 }
 0x19b   : > { %v1828_v1 = vmul.f32 %v2582_v45, %v1756_v34 }
 0x19d   : > { %1844 = vst [vmem:[%s3052_s28 + $0x68] sm:$0xff] %v1828_v1 }
 0x19e   : > { %v2584_v0 = vpop.eup %2583 }
 0x19f   : > { %v1829_v32 = vmul.f32 %v2584_v0, %v1761_v46 }
 0x1a1   : > { %1845 = vst [vmem:[%s3052_s28 + $0x70] sm:$0xff] %v1829_v32 }
 0x1a2   : > { %v2586_v8 = vpop.eup %2585 }
 0x1a3   : > { %v1830_v59 = vmul.f32 %v2586_v8, %v1764_v47 }
 0x1a5   : > { %1846 = vst [vmem:[%s3052_s28 + $0x78] sm:$0xff] %v1830_v59 }
 0x1a6 PF: > { %s13_s12 = sadd.s32 1, %s2593_s12  }
 0x1a7   : > { %p10_p4 = scmp.ge.s32.totalorder %s13_s12, 4  }
 0x1a9   :  { %12 = sbr.rel (!%p10_p4) target bundleno = 1 (0x1), region = 62 }

</bundles_post_ra>
